<compile_context>
chip_gen: v7x
topology: tpu7x:2x2x1
jax: 0.10.0
libtpu: 0.0.40
codegen_flags: <defaults>
</compile_context>

<pallas_src>
import math
import functools

import jax
import jax.numpy as jnp
from jax import lax
from jax.experimental import pallas as pl
from jax.experimental.pallas import tpu as pltpu


# ------------------------------ small helpers ------------------------------ #

def _ceil_to(x, m):
    return ((x + m - 1) // m) * m


def _pad_rows(x, rows):
    if x.shape[0] == rows:
        return x
    pad = [(0, rows - x.shape[0])] + [(0, 0)] * (x.ndim - 1)
    return jnp.pad(x, pad)


def _pad_1d(x, n, val=0):
    if x.shape[0] == n:
        return x
    return jnp.pad(x, (0, n - x.shape[0]), constant_values=val)


def _vmem_budget_bytes():
    # Generation-aware scoped-VMEM budget: ~65% of physical VMEM, clamped to
    # [32 MiB, 96 MiB].  v5e/v6e (128 MiB) -> ~83 MiB, v7x (64 MiB) -> ~41 MiB.
    cap = None
    try:
        info = pltpu.get_tpu_info()
        cap = getattr(info, "vmem_capacity_bytes", None)
    except Exception:
        cap = None
    if not cap:
        cap = 64 * 1024 * 1024          # conservative fallback (v7x-sized)
    budget = int(cap * 0.65)
    return max(32 * 1024 * 1024, min(budget, 96 * 1024 * 1024))


_VMEM_BUDGET = _vmem_budget_bytes()
_PARAMS_PAR = pltpu.CompilerParams(
    dimension_semantics=("parallel",), vmem_limit_bytes=_VMEM_BUDGET)


# --------------------------- kernel 1: tiled linear ------------------------- #
# out = [relu](x @ W + b); x cast to bf16 in-kernel (saves an XLA cast pass),
# f32 MXU accumulation.  Row axis tiled at up to 1024 (megacore-parallel); the
# feature dims (<= 256) stay whole, so no K accumulator / bias-follows-j issue.

def _make_linear_kernel(apply_relu, out_dtype):
    def kernel(x_ref, w_ref, b_ref, o_ref):
        x = x_ref[...].astype(jnp.bfloat16)
        acc = jnp.dot(x, w_ref[...], preferred_element_type=jnp.float32)
        acc = acc + b_ref[...]
        if apply_relu:
            acc = jnp.maximum(acc, 0.0)
        o_ref[...] = acc.astype(out_dtype)
    return kernel


def pallas_linear(x, w_bf16, b_f32, *, apply_relu=False,
                  out_dtype=jnp.bfloat16, tm=1024):
    M, K = x.shape
    _, N = w_bf16.shape
    tm = min(tm, _ceil_to(M, 8))
    Mp = _ceil_to(M, tm)
    xp = _pad_rows(x, Mp)
    b2 = b_f32.reshape(1, N).astype(jnp.float32)
    out = pl.pallas_call(
        _make_linear_kernel(apply_relu, out_dtype),
        out_shape=jax.ShapeDtypeStruct((Mp, N), out_dtype),
        grid_spec=pltpu.PrefetchScalarGridSpec(
            num_scalar_prefetch=0,
            grid=(Mp // tm,),
            in_specs=[
                pl.BlockSpec((tm, K), lambda i: (i, 0)),
                pl.BlockSpec((K, N), lambda i: (0, 0)),
                pl.BlockSpec((1, N), lambda i: (0, 0)),
            ],
            out_specs=pl.BlockSpec((tm, N), lambda i: (i, 0)),
        ),
        compiler_params=_PARAMS_PAR,
    )(xp, w_bf16, b2)
    return out[:M] if Mp != M else out


# -------------- kernel 2: fused gather + 'pre_mult' edge messages ----------- #
# Tables (entity + relation) are VMEM-resident f32 (full BlockSpecs, constant
# index_map); per-edge indices live in SMEM via scalar prefetch.  Each edge row
# is gathered with dynamic-index loads inside a fori_loop (no DMA descriptors,
# no per-row DMA latency).  Output is written f32 so segment_sum consumes it
# directly (no extra bf16->f32 materialization pass).

def _message_kernel(src_ids_ref, rel_ids_ref,     # scalar prefetch (SMEM)
                    ent_ref, rel_ref,             # VMEM-resident f32 tables
                    msg_ref):                     # (te_edge, D) f32 output tile
    te = msg_ref.shape[0]
    base = pl.program_id(0) * te

    def body(r, carry):
        sid = src_ids_ref[base + r]
        rid = rel_ids_ref[base + r]
        hs = ent_ref[pl.ds(sid, 1), :]
        hr = rel_ref[pl.ds(rid, 1), :]
        msg_ref[pl.ds(r, 1), :] = hs * hr
        return carry

    lax.fori_loop(0, te, body, 0, unroll=False)


def pallas_edge_messages(ent_f32, rel_f32, src_ids, rel_ids, *, te_edge=512):
    E = src_ids.shape[0]
    Ne, D = ent_f32.shape
    Nr = rel_f32.shape[0]
    te_edge = min(te_edge, _ceil_to(E, 8))
    Ep = _ceil_to(E, te_edge)
    src_p = _pad_1d(src_ids.astype(jnp.int32), Ep, 0)
    rid_p = _pad_1d(rel_ids.astype(jnp.int32), Ep, 0)
    return pl.pallas_call(
        _message_kernel,
        out_shape=jax.ShapeDtypeStruct((Ep, D), jnp.float32),
        grid_spec=pltpu.PrefetchScalarGridSpec(
            num_scalar_prefetch=2,
            grid=(Ep // te_edge,),
            in_specs=[
                pl.BlockSpec((Ne, D), lambda i, s, r: (0, 0)),   # entity table (resident)
                pl.BlockSpec((Nr, D), lambda i, s, r: (0, 0)),   # relation table (resident)
            ],
            out_specs=pl.BlockSpec((te_edge, D), lambda i, s, r: (i, 0)),
        ),
        compiler_params=_PARAMS_PAR,
    )(src_p, rid_p, ent_f32, rel_f32)


# ----------------------- kernel 3: streamed DistMult score ------------------ #
# q = all_ent[subj] * rel_embed[rel] is built in XLA (B rows, tiny) and passed
# as a plain VMEM input; the entity table is streamed in large (te, D) bf16
# tiles and contracted on the feature axis (no in-kernel transpose).  The grid
# axis over entity tiles is "parallel" (megacore-splittable on v7x).

def _score_kernel(q_ref, ent_ref, o_ref):
    # TODO(synk): DistMult-style stand-in for the undefined MIXED_OPS_sf score_func.
    o_ref[...] = lax.dot_general(
        q_ref[...], ent_ref[...],
        dimension_numbers=(((1,), (1,)), ((), ())),
        preferred_element_type=jnp.float32)


def pallas_score(all_ent_bf16, q_bf16, num_ent, *, te=2048):
    Mrows, D = all_ent_bf16.shape
    B = q_bf16.shape[0]
    Bp = _ceil_to(B, 8)
    te = min(te, _ceil_to(Mrows, 128))
    Mp = _ceil_to(Mrows, te)
    ent_p = _pad_rows(all_ent_bf16, Mp)
    q_p = _pad_rows(q_bf16, Bp)
    # TODO(synk): for large scoring batches, tile the batch axis (128/256) too;
    # with a handful of queries the kernel stays HBM-stream bound by design.
    out = pl.pallas_call(
        _score_kernel,
        out_shape=jax.ShapeDtypeStruct((Bp, Mp), jnp.float32),
        grid_spec=pltpu.PrefetchScalarGridSpec(
            num_scalar_prefetch=0,
            grid=(Mp // te,),
            in_specs=[
                pl.BlockSpec((Bp, D), lambda j: (0, 0)),     # query block (resident)
                pl.BlockSpec((te, D), lambda j: (j, 0)),     # streamed entity tiles
            ],
            out_specs=pl.BlockSpec((Bp, te), lambda j: (0, j)),
        ),
        compiler_params=_PARAMS_PAR,
    )(q_p, ent_p)
    return out[:B, :num_ent]


# --------------------------- parameter initialization ----------------------- #

def _xavier_normal(key, shape, gain):
    fan_in, fan_out = shape[0], shape[1]
    std = gain * math.sqrt(2.0 / (fan_in + fan_out))
    return std * jax.random.normal(key, shape, dtype=jnp.float32)


def init_params(key, num_ent, num_rel, num_base_r, init_fea_dim, feature_dim, n_cells):
    keys = jax.random.split(key, 6 + 2 * n_cells)
    relu_gain = math.sqrt(2.0)
    params = {
        # nn.Embedding default init: N(0, 1)
        "embedding_h": jax.random.normal(keys[0], (num_ent, init_fea_dim), jnp.float32),
        "embedding_e": jax.random.normal(keys[1], (num_base_r, feature_dim), jnp.float32),
        # nn.Linear(init_fea_dim, feature_dim), stored (in, out) for x @ W
        "W_e": _xavier_normal(keys[2], (init_fea_dim, feature_dim), 1.0),
        "b_e": 0.01 * jax.random.normal(keys[3], (feature_dim,), jnp.float32),
        # get_param(xavier_normal_, gain=relu)
        "rel_wt": _xavier_normal(keys[4], (num_rel, num_base_r), relu_gain),
        "w_rel": _xavier_normal(keys[5], (feature_dim, feature_dim), relu_gain),
        "cells": [],
    }
    for i in range(n_cells):
        wc = _xavier_normal(keys[6 + 2 * i], (feature_dim, feature_dim), 1.0)
        bc = 0.01 * jax.random.normal(keys[7 + 2 * i], (feature_dim,), jnp.float32)
        params["cells"].append((wc, bc))
    return params


# ----------------------------------- forward -------------------------------- #

def network_forward(params, src_id, dst_id, e_type, subj, rel, num_ent, num_rel):
    # eval-mode BatchNorm1d with default running stats: x -> x * rsqrt(1 + eps);
    # folded into the concat-Linear weights below.
    inv_bn = 1.0 / math.sqrt(1.0 + 1e-5)

    # TODO(synk): all_ent_emb and the rel_embed @ w_rel chain depend only on the
    # parameters in eval mode and could be cached across forwards; here they are
    # computed once per call.
    all_ent = pallas_linear(params["embedding_h"],
                            params["W_e"].astype(jnp.bfloat16),
                            params["b_e"], apply_relu=False)

    # rel_embed = rel_wt @ embedding_e[arange(num_base_r)]   (tiny -> XLA)
    rel_embed = jnp.dot(params["rel_wt"], params["embedding_e"],
                        preferred_element_type=jnp.float32)

    # graph index arrays: original edges + one self-loop per node (relation num_rel-1)
    nodes = jnp.arange(num_ent, dtype=jnp.int32)
    src_final = jnp.concatenate([src_id.astype(jnp.int32), nodes])
    dst_final = jnp.concatenate([dst_id.astype(jnp.int32), nodes])
    etype_final = jnp.concatenate(
        [e_type.astype(jnp.int32), jnp.full((num_ent,), num_rel - 1, jnp.int32)])
    n_edges_total = src_final.shape[0]

    D = all_ent.shape[1]
    # Generation-aware residency: f32 entity table x2 (double-buffered BlockSpec)
    # must fit well inside the scoped-VMEM budget.
    ent_table_resident = (num_ent * D * 4) * 2 <= (_VMEM_BUDGET * 2) // 3

    for wc, bc in params["cells"]:
        wc_eff = (wc * inv_bn).astype(jnp.bfloat16)   # BN folded into Linear
        bc_eff = bc * inv_bn
        rel_f32 = rel_embed.astype(jnp.float32)

        # node 1 ('pre_mult', no BN/ReLU): per-edge compose, then aggregate to dst
        if ent_table_resident:
            ent_f32 = all_ent.astype(jnp.float32)
            msgs = pallas_edge_messages(ent_f32, rel_f32, src_final, etype_final)
            msgs = msgs[:n_edges_total]
        else:
            # TODO(synk): batched/sorted DMA gather for huge entity tables not
            # implemented in Pallas; fall back to an XLA gather + multiply.
            msgs = all_ent[src_final].astype(jnp.float32) * rel_f32[etype_final]

        # TODO(synk): scatter-add left to XLA (segment_sum), not Pallas.
        zero_out = jax.ops.segment_sum(msgs, dst_final, num_segments=num_ent)

        # cell tail: concat([zero_out]) -> Linear -> BN(folded) -> ReLU
        # (f32 input; the kernel casts to bf16 internally)
        all_ent = pallas_linear(zero_out, wc_eff, bc_eff, apply_relu=True)

        # F.dropout(..., training=False) -> identity
        # rel_embed = rel_embed @ w_rel  (tiny -> XLA)
        rel_embed = jnp.dot(rel_embed, params["w_rel"],
                            preferred_element_type=jnp.float32)

    # q = all_ent[subj] * rel_embed[rel], hoisted out of the score kernel (B rows).
    q = (all_ent[subj.astype(jnp.int32)].astype(jnp.float32)
         * rel_embed[rel.astype(jnp.int32)]).astype(jnp.bfloat16)
    return pallas_score(all_ent, q, num_ent)


# ------------------------------------ main ----------------------------------- #

if __name__ == "__main__":
    NUM_ENT = 32
    NUM_RELS = 3
    NUM_REL = NUM_RELS * 2 + 1          # 7 (incl. self-loop relation)
    NUM_BASE_R = 4
    INIT_FEA_DIM = 16
    FEATURE_DIM = 128                   # lane-dense (multiple of 128)
    N_CELLS = 2
    N_EDGES = 16
    BATCH = 4

    key = jax.random.PRNGKey(0)
    k_param, k_src, k_dst, k_etype, k_subj, k_rel = jax.random.split(key, 6)

    params = init_params(
        k_param, NUM_ENT, NUM_REL, NUM_BASE_R, INIT_FEA_DIM, FEATURE_DIM, N_CELLS)

    # synthetic graph (DGL g.edges / g.edata['e_type'] materialized as arrays)
    src_id = jax.random.randint(k_src, (N_EDGES,), 0, NUM_ENT, dtype=jnp.int32)
    dst_id = jax.random.randint(k_dst, (N_EDGES,), 0, NUM_ENT, dtype=jnp.int32)
    e_type = jax.random.randint(k_etype, (N_EDGES,), 0, NUM_REL - 1, dtype=jnp.int32)
    subj = jax.random.randint(k_subj, (BATCH,), 0, NUM_ENT, dtype=jnp.int32)
    rel = jax.random.randint(k_rel, (BATCH,), 0, NUM_REL, dtype=jnp.int32)

    fwd = jax.jit(functools.partial(network_forward,
                                    num_ent=NUM_ENT, num_rel=NUM_REL))
    score = jax.block_until_ready(fwd(params, src_id, dst_id, e_type, subj, rel))

    assert score.shape == (BATCH, NUM_ENT)
    assert bool(jnp.all(jnp.isfinite(score)))
    print("KERNEL_OK")
</pallas_src>

<mosaic_0001>
module attributes {stable_mosaic.version = 11 : i64} {
  func.func @kernel(%arg0: i32, %arg1: memref<32x16xf32, #tpu.memory_space<vmem>>, %arg2: memref<16x128xbf16, #tpu.memory_space<vmem>>, %arg3: memref<1x128xf32, #tpu.memory_space<vmem>>, %arg4: memref<32x128xbf16, #tpu.memory_space<vmem>>) attributes {dimension_semantics = [#tpu.dimension_semantics<parallel>], iteration_bounds = array<i64: 1>, scalar_prefetch = 0 : i64, scratch_operands = 0 : i64, tpu.core_type = #tpu.core_type<tc>, window_params = [{transform_indices = @transform_0, window_bounds = array<i64: 32, 16>}, {pipeline_mode = #tpu.pipeline_mode<synchronous>, transform_indices = @transform_1, window_bounds = array<i64: 16, 128>}, {pipeline_mode = #tpu.pipeline_mode<synchronous>, transform_indices = @transform_2, window_bounds = array<i64: 1, 128>}, {transform_indices = @transform_3, window_bounds = array<i64: 32, 128>}]} {
    %c0 = arith.constant 0 : index
    %c0_0 = arith.constant 0 : index
    %0 = vector.load %arg1[%c0, %c0_0] : memref<32x16xf32, #tpu.memory_space<vmem>>, vector<32x16xf32>
    %1 = arith.truncf %0 : vector<32x16xf32> to vector<32x16xbf16>
    %c0_1 = arith.constant 0 : index
    %c0_2 = arith.constant 0 : index
    %2 = vector.load %arg2[%c0_1, %c0_2] : memref<16x128xbf16, #tpu.memory_space<vmem>>, vector<16x128xbf16>
    %cst = arith.constant dense<0.000000e+00> : vector<32x128xf32>
    %3 = tpu.matmul %1, %2, %cst {dimension_numbers = #tpu.dot_dimension_numbers<[1], [0], [0], [1], [0, 0, 1, 1], [], []>} : vector<32x16xbf16>, vector<16x128xbf16>, vector<32x128xf32> -> vector<32x128xf32>
    %c0_3 = arith.constant 0 : index
    %c0_4 = arith.constant 0 : index
    %4 = vector.load %arg3[%c0_3, %c0_4] : memref<1x128xf32, #tpu.memory_space<vmem>>, vector<1x128xf32>
    %5 = vector.broadcast %4 : vector<1x128xf32> to vector<32x128xf32>
    %6 = arith.addf %3, %5 : vector<32x128xf32>
    %7 = arith.truncf %6 : vector<32x128xf32> to vector<32x128xbf16>
    %c0_5 = arith.constant 0 : index
    %c0_6 = arith.constant 0 : index
    %8 = vector.load %arg4[%c0_5, %c0_6] : memref<32x128xbf16, #tpu.memory_space<vmem>>, vector<32x128xbf16>
    tpu.vector_store %arg4[%c0_5, %c0_6], %7 {strides = array<i32>} : memref<32x128xbf16, #tpu.memory_space<vmem>>, vector<32x128xbf16>,
    return
  }
  func.func @transform_0(%arg0: i32) -> (i32, i32) {
    %c0_i32 = arith.constant 0 : i32
    %c0_i32_0 = arith.constant 0 : i32
    return %arg0, %c0_i32 : i32, i32
  }
  func.func @transform_1(%arg0: i32) -> (i32, i32) {
    %c0_i32 = arith.constant 0 : i32
    %c0_i32_0 = arith.constant 0 : i32
    %c0_i32_1 = arith.constant 0 : i32
    return %c0_i32, %c0_i32_0 : i32, i32
  }
  func.func @transform_2(%arg0: i32) -> (i32, i32) {
    %c0_i32 = arith.constant 0 : i32
    %c0_i32_0 = arith.constant 0 : i32
    %c0_i32_1 = arith.constant 0 : i32
    return %c0_i32, %c0_i32_0 : i32, i32
  }
  func.func @transform_3(%arg0: i32) -> (i32, i32) {
    %c0_i32 = arith.constant 0 : i32
    %c0_i32_0 = arith.constant 0 : i32
    return %arg0, %c0_i32 : i32, i32
  }
}

module attributes {stable_mosaic.version = 11 : i64} {
  func.func @_message_kernel(%arg0: i32, %arg1: memref<48xi32, #tpu.memory_space<smem>>, %arg2: memref<48xi32, #tpu.memory_space<smem>>, %arg3: memref<32x128xf32, #tpu.memory_space<vmem>>, %arg4: memref<7x128xf32, #tpu.memory_space<vmem>>, %arg5: memref<48x128xf32, #tpu.memory_space<vmem>>) attributes {dimension_semantics = [#tpu.dimension_semantics<parallel>], iteration_bounds = array<i64: 1>, scalar_prefetch = 2 : i64, scratch_operands = 0 : i64, tpu.core_type = #tpu.core_type<tc>, window_params = [{pipeline_mode = #tpu.pipeline_mode<synchronous>, transform_indices = @transform_0, window_bounds = array<i64: 32, 128>}, {pipeline_mode = #tpu.pipeline_mode<synchronous>, transform_indices = @transform_1, window_bounds = array<i64: 7, 128>}, {transform_indices = @transform_2, window_bounds = array<i64: 48, 128>}]} {
    %c48_i32 = arith.constant 48 : i32
    %0 = arith.muli %arg0, %c48_i32 : i32
    %c0_i32 = arith.constant 0 : i32
    %c48_i32_0 = arith.constant 48 : i32
    %1 = arith.addi %c0_i32, %c48_i32_0 : i32
    %c1_i32 = arith.constant 1 : i32
    scf.for %arg6 = %c0_i32 to %1 step %c1_i32  : i32 {
      %2 = arith.addi %0, %arg6 : i32
      %3 = arith.index_cast %2 : i32 to index
      %4 = memref.load %arg1[%3] : memref<48xi32, #tpu.memory_space<smem>>
      %5 = arith.addi %0, %arg6 : i32
      %6 = arith.index_cast %5 : i32 to index
      %7 = memref.load %arg2[%6] : memref<48xi32, #tpu.memory_space<smem>>
      %8 = arith.index_cast %4 : i32 to index
      %c0 = arith.constant 0 : index
      %9 = vector.load %arg3[%8, %c0] : memref<32x128xf32, #tpu.memory_space<vmem>>, vector<1x128xf32>
      %10 = arith.index_cast %7 : i32 to index
      %c0_2 = arith.constant 0 : index
      %11 = vector.load %arg4[%10, %c0_2] : memref<7x128xf32, #tpu.memory_space<vmem>>, vector<1x128xf32>
      %12 = arith.mulf %9, %11 : vector<1x128xf32>
      %13 = arith.index_cast %arg6 : i32 to index
      %c0_3 = arith.constant 0 : index
      %14 = vector.load %arg5[%13, %c0_3] : memref<48x128xf32, #tpu.memory_space<vmem>>, vector<1x128xf32>
      tpu.vector_store %arg5[%13, %c0_3], %12 {strides = array<i32>} : memref<48x128xf32, #tpu.memory_space<vmem>>, vector<1x128xf32>,
    }
    %c48_i32_1 = arith.constant 48 : i32
    return
  }
  func.func @transform_0(%arg0: i32, %arg1: memref<48xi32, #tpu.memory_space<smem>>, %arg2: memref<48xi32, #tpu.memory_space<smem>>) -> (i32, i32) {
    %c0_i32 = arith.constant 0 : i32
    %c0_i32_0 = arith.constant 0 : i32
    %c0_i32_1 = arith.constant 0 : i32
    return %c0_i32, %c0_i32_0 : i32, i32
  }
  func.func @transform_1(%arg0: i32, %arg1: memref<48xi32, #tpu.memory_space<smem>>, %arg2: memref<48xi32, #tpu.memory_space<smem>>) -> (i32, i32) {
    %c0_i32 = arith.constant 0 : i32
    %c0_i32_0 = arith.constant 0 : i32
    %c0_i32_1 = arith.constant 0 : i32
    return %c0_i32, %c0_i32_0 : i32, i32
  }
  func.func @transform_2(%arg0: i32, %arg1: memref<48xi32, #tpu.memory_space<smem>>, %arg2: memref<48xi32, #tpu.memory_space<smem>>) -> (i32, i32) {
    %c0_i32 = arith.constant 0 : i32
    %c0_i32_0 = arith.constant 0 : i32
    return %arg0, %c0_i32 : i32, i32
  }
}

module attributes {stable_mosaic.version = 11 : i64} {
  func.func @kernel(%arg0: i32, %arg1: memref<32x128xf32, #tpu.memory_space<vmem>>, %arg2: memref<128x128xbf16, #tpu.memory_space<vmem>>, %arg3: memref<1x128xf32, #tpu.memory_space<vmem>>, %arg4: memref<32x128xbf16, #tpu.memory_space<vmem>>) attributes {dimension_semantics = [#tpu.dimension_semantics<parallel>], iteration_bounds = array<i64: 1>, scalar_prefetch = 0 : i64, scratch_operands = 0 : i64, tpu.core_type = #tpu.core_type<tc>, window_params = [{transform_indices = @transform_0, window_bounds = array<i64: 32, 128>}, {pipeline_mode = #tpu.pipeline_mode<synchronous>, transform_indices = @transform_1, window_bounds = array<i64: 128, 128>}, {pipeline_mode = #tpu.pipeline_mode<synchronous>, transform_indices = @transform_2, window_bounds = array<i64: 1, 128>}, {transform_indices = @transform_3, window_bounds = array<i64: 32, 128>}]} {
    %c0 = arith.constant 0 : index
    %c0_0 = arith.constant 0 : index
    %0 = vector.load %arg1[%c0, %c0_0] : memref<32x128xf32, #tpu.memory_space<vmem>>, vector<32x128xf32>
    %1 = arith.truncf %0 : vector<32x128xf32> to vector<32x128xbf16>
    %c0_1 = arith.constant 0 : index
    %c0_2 = arith.constant 0 : index
    %2 = vector.load %arg2[%c0_1, %c0_2] : memref<128x128xbf16, #tpu.memory_space<vmem>>, vector<128x128xbf16>
    %cst = arith.constant dense<0.000000e+00> : vector<32x128xf32>
    %3 = tpu.matmul %1, %2, %cst {dimension_numbers = #tpu.dot_dimension_numbers<[1], [0], [0], [1], [0, 0, 1, 1], [], []>} : vector<32x128xbf16>, vector<128x128xbf16>, vector<32x128xf32> -> vector<32x128xf32>
    %c0_3 = arith.constant 0 : index
    %c0_4 = arith.constant 0 : index
    %4 = vector.load %arg3[%c0_3, %c0_4] : memref<1x128xf32, #tpu.memory_space<vmem>>, vector<1x128xf32>
    %5 = vector.broadcast %4 : vector<1x128xf32> to vector<32x128xf32>
    %6 = arith.addf %3, %5 : vector<32x128xf32>
    %cst_5 = arith.constant 0.000000e+00 : f32
    %7 = vector.broadcast %cst_5 : f32 to vector<32x128xf32>
    %8 = arith.maximumf %6, %7 : vector<32x128xf32>
    %9 = arith.truncf %8 : vector<32x128xf32> to vector<32x128xbf16>
    %c0_6 = arith.constant 0 : index
    %c0_7 = arith.constant 0 : index
    %10 = vector.load %arg4[%c0_6, %c0_7] : memref<32x128xbf16, #tpu.memory_space<vmem>>, vector<32x128xbf16>
    tpu.vector_store %arg4[%c0_6, %c0_7], %9 {strides = array<i32>} : memref<32x128xbf16, #tpu.memory_space<vmem>>, vector<32x128xbf16>,
    return
  }
  func.func @transform_0(%arg0: i32) -> (i32, i32) {
    %c0_i32 = arith.constant 0 : i32
    %c0_i32_0 = arith.constant 0 : i32
    return %arg0, %c0_i32 : i32, i32
  }
  func.func @transform_1(%arg0: i32) -> (i32, i32) {
    %c0_i32 = arith.constant 0 : i32
    %c0_i32_0 = arith.constant 0 : i32
    %c0_i32_1 = arith.constant 0 : i32
    return %c0_i32, %c0_i32_0 : i32, i32
  }
  func.func @transform_2(%arg0: i32) -> (i32, i32) {
    %c0_i32 = arith.constant 0 : i32
    %c0_i32_0 = arith.constant 0 : i32
    %c0_i32_1 = arith.constant 0 : i32
    return %c0_i32, %c0_i32_0 : i32, i32
  }
  func.func @transform_3(%arg0: i32) -> (i32, i32) {
    %c0_i32 = arith.constant 0 : i32
    %c0_i32_0 = arith.constant 0 : i32
    return %arg0, %c0_i32 : i32, i32
  }
}

module attributes {stable_mosaic.version = 11 : i64} {
  func.func @_score_kernel(%arg0: i32, %arg1: memref<8x128xbf16, #tpu.memory_space<vmem>>, %arg2: memref<128x128xbf16, #tpu.memory_space<vmem>>, %arg3: memref<8x128xf32, #tpu.memory_space<vmem>>) attributes {dimension_semantics = [#tpu.dimension_semantics<parallel>], iteration_bounds = array<i64: 1>, scalar_prefetch = 0 : i64, scratch_operands = 0 : i64, tpu.core_type = #tpu.core_type<tc>, window_params = [{pipeline_mode = #tpu.pipeline_mode<synchronous>, transform_indices = @transform_0, window_bounds = array<i64: 8, 128>}, {transform_indices = @transform_1, window_bounds = array<i64: 128, 128>}, {transform_indices = @transform_2, window_bounds = array<i64: 8, 128>}]} {
    %c0 = arith.constant 0 : index
    %c0_0 = arith.constant 0 : index
    %0 = vector.load %arg1[%c0, %c0_0] : memref<8x128xbf16, #tpu.memory_space<vmem>>, vector<8x128xbf16>
    %c0_1 = arith.constant 0 : index
    %c0_2 = arith.constant 0 : index
    %1 = vector.load %arg2[%c0_1, %c0_2] : memref<128x128xbf16, #tpu.memory_space<vmem>>, vector<128x128xbf16>
    %cst = arith.constant dense<0.000000e+00> : vector<8x128xf32>
    %2 = tpu.matmul %0, %1, %cst {dimension_numbers = #tpu.dot_dimension_numbers<[1], [1], [0], [0], [0, 0, 1, 0], [], []>} : vector<8x128xbf16>, vector<128x128xbf16>, vector<8x128xf32> -> vector<8x128xf32>
    %c0_3 = arith.constant 0 : index
    %c0_4 = arith.constant 0 : index
    %3 = vector.load %arg3[%c0_3, %c0_4] : memref<8x128xf32, #tpu.memory_space<vmem>>, vector<8x128xf32>
    tpu.vector_store %arg3[%c0_3, %c0_4], %2 {strides = array<i32>} : memref<8x128xf32, #tpu.memory_space<vmem>>, vector<8x128xf32>,
    return
  }
  func.func @transform_0(%arg0: i32) -> (i32, i32) {
    %c0_i32 = arith.constant 0 : i32
    %c0_i32_0 = arith.constant 0 : i32
    %c0_i32_1 = arith.constant 0 : i32
    return %c0_i32, %c0_i32_0 : i32, i32
  }
  func.func @transform_1(%arg0: i32) -> (i32, i32) {
    %c0_i32 = arith.constant 0 : i32
    %c0_i32_0 = arith.constant 0 : i32
    return %arg0, %c0_i32 : i32, i32
  }
  func.func @transform_2(%arg0: i32) -> (i32, i32) {
    %c0_i32 = arith.constant 0 : i32
    %c0_i32_0 = arith.constant 0 : i32
    return %c0_i32, %arg0 : i32, i32
  }
}

</mosaic_0001>

<bundles_post_ra>
// kernel: network_forward.6
= control target key start
LH: loop header
LB: loop body
LE: loop exit
PB: predicated region body
PF: predicated region fallthrough
CT: control target
= control target key end

     0   :  { %vm36_vm0 = vcmask 130048   ;;  %s193_s1 = inlined_call_operand.vmem [shape: bf16[16,128], index: 1, kind: input, shape index: {}]   ;;  %s194_s0 = inlined_call_operand.vmem [shape: f32[32,16], index: 0, kind: input, shape index: {}]   ;;  %s195_s2 = inlined_call_operand.vmem [shape: f32[1,128], index: 2, kind: input, shape index: {}]   ;;  %s196_s3 = inlined_call_operand.vmem [shape: bf16[32,128], index: 3, kind: output, shape index: {}]  }
   0x1   :  { %v148_v0 = vld [vmem:[%s193_s1] sm:$0xff]   ;;  %v16_v2 = vld [vmem:[%s194_s0 + $0x8] sm:$0xff]  ;;  %v17_v3 = vld [vmem:[%s194_s0 + $0x10] sm:$0xff] }
   0x2   :  { %v15_v1 = vld [vmem:[%s194_s0] sm:$0xff]  ;;  %142 = vmatprep.subr.bf16.mxu0 %v148_v0  ;;  %v18_v5 = vld [vmem:[%s194_s0 + $0x18] sm:$0xff] }
   0x3   :  { %v19_v4 = vpack.c.bf16 %v16_v2, %v15_v1  ;;  %143 = vmatpush3.bf16.msra.mxu0 %v148_v0  ;;  %v20_v6 = vpack.c.bf16 %v18_v5, %v17_v3  ;;  %v116_v8 = vld [vmem:[%s195_s2] ss:$0 sm:$0xff] }
   0x5   :  { %144 = vmatprep.mubr.msk.bf16.mxu0 %vm36_vm0, %v19_v4 }
   0x6   :  { %145 = vmatmul.mubr.msk.bf16.vlgmr.msra.gmra.mrb[0].mxu0 %vm36_vm0, %v20_v6 }
  0xd9   :  { %v146_v7 = vpop.f32.mrb[0].mxu0 }
  0xda   :  { %v77_v9 = vpop.f32.mrb[1].mxu0  ;;  %v86_v11 = vadd.f32 %v146_v7, %v116_v8 }
  0xdb   :  { %v147_v10 = vpop.f32.mrb[2].mxu0  ;;  %v78_v14 = vadd.f32 %v116_v8, %v77_v9 }
  0xdc   :  { %v89_v12 = vadd.f32 %v147_v10, %v116_v8  ;;  %v80_v13 = vpop.f32.mrb[3].mxu0 }
  0xdd   :  { %v81_v15 = vadd.f32 %v116_v8, %v80_v13 }
  0xde   :  { %v136_v16 = vpack.c.bf16 %v89_v12, %v86_v11 }
  0xdf   :  { %v131_v17 = vpack.c.bf16 %v81_v15, %v78_v14 }
  0xe0   :  { %138 = vst [vmem:[%s196_s3 + $0x8] sm:$0xff] %v136_v16  }
  0xe1   :  { %132 = vst [vmem:[%s196_s3] sm:$0xff] %v131_v17  }

// kernel: network_forward.7
= control target key start
LH: loop header
LB: loop body
LE: loop exit
PB: predicated region body
PF: predicated region fallthrough
CT: control target
= control target key end

     0   :  { %s138_s0 = inlined_call_operand.vmem [shape: s32[48], index: 0, kind: input, shape index: {}]   ;;  %s139_s2 = inlined_call_operand.vmem [shape: f32[32,128], index: 2, kind: input, shape index: {}]   ;;  %s140_s3 = inlined_call_operand.vmem [shape: f32[7,128], index: 3, kind: input, shape index: {}]   ;;  %s141_s4 = inlined_call_operand.vmem [shape: f32[48,128], index: 4, kind: output, shape index: {}]   ;;  %s142_s1 = inlined_call_operand.vmem [shape: s32[48], index: 1, kind: input, shape index: {}]  }
   0x1   :  { %s9_s17 = sshll.u32 %s138_s0, 4  ;;  %s13_s20 = sshll.u32 %s142_s1, 4  ;;  %s10_s17 = int_to_ptr.vmem [resolvable:$true] %s9_s17  ;;  %s14_s20 = int_to_ptr.vmem [resolvable:$true] %s13_s20 }
   0x2   :  { %s62_s21 = scalar_lea.vmem %s10_s17, 16  ;;  %p67_p1 = scmp.lt.s32.totalorder %s10_s17, %s10_s17 }
   0x3   :  { %p63_p0 = scmp.ne.s32.totalorder %s10_s17, %s62_s21  ;;  %p68_p2 = scmp.lt.s32.totalorder %s62_s21, %s62_s21 }
   0x5   :  { %p69_p3 = por %p68_p2, %p67_p1 }
   0x7   :  { %p70_p4 = pnand %p69_p3, %p63_p0 }
   0x9   :  { %73 = shalt.err (!%p70_p4)  }
   0xa   :  { %s96_s22 = smov [#allocation3]   ;;  %s74_s23 = scalar_lea.vmem %s14_s20, 16 }
   0xb   :  { %12 = dma.vmem_to_smem %s10_s17, 16, %s96_s22, [#allocation2] }
   0xc   :  { %p75_p5 = scmp.ne.s32.totalorder %s14_s20, %s74_s23  ;;  %p79_p6 = scmp.lt.s32.totalorder %s14_s20, %s14_s20 }
   0xd   :  { %p80_p7 = scmp.lt.s32.totalorder %s74_s23, %s74_s23 }
   0xf   :  { %p81_p8 = por %p80_p7, %p79_p6 }
  0x11   :  { %p82_p9 = pnand %p81_p8, %p75_p5 }
  0x13   :  { %85 = shalt.err (!%p82_p9)  }
  0x14   :  { %s97_s0 = smov [#allocation4]  }
  0x15   :  { %16 = dma.vmem_to_smem %s14_s20, 16, %s97_s0, [#allocation2] }
  0x16   :  { %90 = dma.done.wait [#allocation2], 32 }
  0x17   :  { %91 = vsyncadd [#allocation2], 4294967264 }
  0x18   :  { %18 = sfence }
  0x19   :  { %s92_s1 = smov 0  }
  0x1a LB: > { %s31_s24 = sld [smem:[#allocation3 + %s94_s1]]  ;;  %s38_s8 = scalar_lea.vmem %s141_s4, %s94_s1  ;;  %s94_s1 = sphi %s92_s1, %s29_s1  }
  0x1b   : > { %s32_s25 = sld [smem:[#allocation4 + %s94_s1]]  ;;  %s29_s1 = sadd.s32 1, %s94_s1  }
  0x1c   : > { %p26_p10 = scmp.ge.s32.totalorder %s29_s1, 48  }
  0x1f   :  { %28 = sbr.rel (!%p26_p10) target bundleno = 26 (0x1a), region = 38 }
  0x20   : > { %s33_s28 = scalar_lea.vmem %s139_s2, %s31_s24 }
  0x21   : > { %s35_s5 = scalar_lea.vmem %s140_s3, %s32_s25  ;;  %v34_v0 = vld [vmem:[%s33_s28] sm:$0x1] }
  0x22   : > { %v36_v1 = vld [vmem:[%s35_s5] sm:$0x1] }
  0x23   : > { %v37_v2 = vmul.f32 %v36_v1, %v34_v0 }
  0x25   : > { %39 = vst [vmem:[%s38_s8] sm:$0x1] %v37_v2 }

// kernel: network_forward.8
= control target key start
LH: loop header
LB: loop body
LE: loop exit
PB: predicated region body
PF: predicated region fallthrough
CT: control target
= control target key end

     0   :  { %s300_s1 = inlined_call_operand.vmem [shape: bf16[128,128], index: 1, kind: input, shape index: {}]   ;;  %s301_s0 = inlined_call_operand.vmem [shape: f32[32,128], index: 0, kind: input, shape index: {}]   ;;  %s302_s2 = inlined_call_operand.vmem [shape: f32[1,128], index: 2, kind: input, shape index: {}]   ;;  %s303_s3 = inlined_call_operand.vmem [shape: bf16[32,128], index: 3, kind: output, shape index: {}]  }
   0x1   :  { %v227_v0 = vld [vmem:[%s300_s1] sm:$0xff]   ;;  %v228_v1 = vld [vmem:[%s300_s1 + $0x8] sm:$0xff]   ;;  %v229_v2 = vld [vmem:[%s300_s1 + $0x10] sm:$0xff]  }
   0x2   :  { %207 = vmatprep.subr.bf16.mxu0 %v227_v0  ;;  %v230_v3 = vld [vmem:[%s300_s1 + $0x18] sm:$0xff]   ;;  %v15_v4 = vld [vmem:[%s301_s0] sm:$0xff]  ;;  %v16_v5 = vld [vmem:[%s301_s0 + $0x8] sm:$0xff] }
   0x3   :  { %208 = vmatpush3.bf16.msra.mxu0 %v227_v0  ;;  %v19_v6 = vpack.c.bf16 %v16_v5, %v15_v4  ;;  %v231_v7 = vld [vmem:[%s300_s1 + $0x20] sm:$0xff]   ;;  %v232_v8 = vld [vmem:[%s300_s1 + $0x28] sm:$0xff]   ;;  %v233_v9 = vld [vmem:[%s300_s1 + $0x30] sm:$0xff]  }
   0x4   :  { %209 = vmatprep.subr.bf16.mxu0 %v228_v1  ;;  %v234_v10 = vld [vmem:[%s300_s1 + $0x38] sm:$0xff]   ;;  %v17_v11 = vld [vmem:[%s301_s0 + $0x10] sm:$0xff]  ;;  %v169_v14 = vld [vmem:[%s302_s2] ss:$0 sm:$0xff] }
   0x5   :  { %223 = vmatprep.mubr.bf16.mxu0 %v19_v6  ;;  %v18_v12 = vld [vmem:[%s301_s0 + $0x18] sm:$0xff] }
   0x6   :  { %v20_v13 = vpack.c.bf16 %v18_v12, %v17_v11 }
   0x7   :  { %210 = vmatpush3.bf16.msra.mxu0 %v228_v1 }
   0x8   :  { %211 = vmatprep.subr.bf16.mxu0 %v229_v2 }
   0xb   :  { %212 = vmatpush3.bf16.msra.mxu0 %v229_v2 }
   0xc   :  { %213 = vmatprep.subr.bf16.mxu0 %v230_v3 }
   0xf   :  { %214 = vmatpush3.bf16.msra.mxu0 %v230_v3 }
  0x10   :  { %215 = vmatprep.subr.bf16.mxu0 %v231_v7 }
  0x13   :  { %216 = vmatpush3.bf16.msra.mxu0 %v231_v7 }
  0x14   :  { %217 = vmatprep.subr.bf16.mxu0 %v232_v8 }
  0x17   :  { %218 = vmatpush3.bf16.msra.mxu0 %v232_v8 }
  0x18   :  { %219 = vmatprep.subr.bf16.mxu0 %v233_v9 }
  0x1b   :  { %220 = vmatpush3.bf16.msra.mxu0 %v233_v9 }
  0x1c   :  { %221 = vmatprep.subr.bf16.mxu0 %v234_v10 }
  0x1f   :  { %222 = vmatpush3.bf16.msra.mxu0 %v234_v10 }
  0x22   :  { %224 = vmatmul.mubr.bf16.vlgmr.msra.gmra.mrb[0].mxu0 %v20_v13 }
  0xf5   :  { %v225_v15 = vpop.f32.mrb[0].mxu0 }
  0xf6   :  { %v135_v16 = vadd.f32 %v225_v15, %v169_v14  ;;  %v126_v17 = vpop.f32.mrb[1].mxu0 }
  0xf7   :  { %v127_v18 = vadd.f32 %v169_v14, %v126_v17  ;;  %v226_v19 = vpop.f32.mrb[2].mxu0 }
  0xf8   :  { %v138_v20 = vadd.f32 %v226_v19, %v169_v14  ;;  %v129_v21 = vpop.f32.mrb[3].mxu0  ;;  %v143_v23 = vmax.f32 %v135_v16, 0.0 }
  0xf9   :  { %v130_v22 = vadd.f32 %v169_v14, %v129_v21  ;;  %v141_v25 = vmax.f32 %v127_v18, 0.0 }
  0xfa   :  { %v144_v24 = vmax.f32 %v138_v20, 0.0 }
  0xfb   :  { %v142_v26 = vmax.f32 %v130_v22, 0.0 }
  0xfc   :  { %v194_v27 = vpack.c.bf16 %v144_v24, %v143_v23 }
  0xfd   :  { %v189_v28 = vpack.c.bf16 %v142_v26, %v141_v25 }
  0xfe   :  { %196 = vst [vmem:[%s303_s3 + $0x8] sm:$0xff] %v194_v27  }
  0xff   :  { %190 = vst [vmem:[%s303_s3] sm:$0xff] %v189_v28  }

// kernel: network_forward.11
= control target key start
LH: loop header
LB: loop body
LE: loop exit
PB: predicated region body
PF: predicated region fallthrough
CT: control target
= control target key end

     0   :  { %v169_v0 = vmov 0.0   ;;  %vm170_vm0 = vmmov 0   ;;  %s216_s1 = inlined_call_operand.vmem [shape: bf16[128,128], index: 1, kind: input, shape index: {}]   ;;  %s217_s0 = inlined_call_operand.vmem [shape: bf16[8,128], index: 0, kind: input, shape index: {}]   ;;  %s218_s2 = inlined_call_operand.vmem [shape: f32[8,128], index: 2, kind: output, shape index: {}]  }
   0x1   :  { %139 = vmatprep.subr.bf16.mxu0 %v169_v0  ;;  %v161_v1 = vld [vmem:[%s216_s1] sm:$0xff]   ;;  %155 = vmatprep.mubr.msk.bf16.mxu0 %vm170_vm0, %v169_v0  ;;  %v162_v2 = vld [vmem:[%s216_s1 + $0x8] sm:$0xff]   ;;  %v163_v3 = vld [vmem:[%s216_s1 + $0x10] sm:$0xff]  }
   0x2   :  { %140 = vmatpush3.bf16.xpose.msra.mxu0 %v161_v1  ;;  %v164_v4 = vld [vmem:[%s216_s1 + $0x18] sm:$0xff]   ;;  %v165_v5 = vld [vmem:[%s216_s1 + $0x20] sm:$0xff]   ;;  %v166_v6 = vld [vmem:[%s216_s1 + $0x28] sm:$0xff]  }
   0x3   :  { %141 = vmatprep.subr.bf16.mxu0 %v169_v0  ;;  %v167_v7 = vld [vmem:[%s216_s1 + $0x30] sm:$0xff]   ;;  %v168_v8 = vld [vmem:[%s216_s1 + $0x38] sm:$0xff]   ;;  %v12_v9 = vld [vmem:[%s217_s0] sm:$0xf] }
   0xa   :  { %142 = vmatpush3.bf16.xpose.msra.mxu0 %v162_v2 }
   0xb   :  { %143 = vmatprep.subr.bf16.mxu0 %v169_v0 }
  0x12   :  { %144 = vmatpush3.bf16.xpose.msra.mxu0 %v163_v3 }
  0x13   :  { %145 = vmatprep.subr.bf16.mxu0 %v169_v0 }
  0x1a   :  { %146 = vmatpush3.bf16.xpose.msra.mxu0 %v164_v4 }
  0x1b   :  { %147 = vmatprep.subr.bf16.mxu0 %v169_v0 }
  0x22   :  { %148 = vmatpush3.bf16.xpose.msra.mxu0 %v165_v5 }
  0x23   :  { %149 = vmatprep.subr.bf16.mxu0 %v169_v0 }
  0x2a   :  { %150 = vmatpush3.bf16.xpose.msra.mxu0 %v166_v6 }
  0x2b   :  { %151 = vmatprep.subr.bf16.mxu0 %v169_v0 }
  0x32   :  { %152 = vmatpush3.bf16.xpose.msra.mxu0 %v167_v7 }
  0x33   :  { %153 = vmatprep.subr.bf16.mxu0 %v169_v0 }
  0x3a   :  { %154 = vmatpush3.bf16.xpose.msra.mxu0 %v168_v8 }
  0x41   :  { %156 = vmatmul.mubr.bf16.vlgmr.msra.gmra.mrb[0].mxu0 %v12_v9 }
 0x114   :  { %v111_v10 = vpop.f32.mrb[0].mxu0 }
 0x115   :  { %117 = vst [vmem:[%s218_s2] sm:$0xff] %v111_v10  ;;  %v157_v11 = vpop.f32.mrb[1].mxu0 }
 0x116   :  { %v114_v12 = vpop.f32.mrb[2].mxu0 }
 0x117   :  { %v158_v13 = vpop.f32.mrb[3].mxu0 }

</bundles_post_ra>
